<compile_context>
chip_gen: v6e
topology: v6e:2x2x1
jax: 0.10.0
libtpu: 0.0.40
codegen_flags: <defaults>
</compile_context>

<pallas_src>
import math

import numpy as np

import jax
import jax.numpy as jnp
from jax.experimental import pallas as pl
from jax.experimental.pallas import tpu as pltpu


def _round_up(x: int, m: int) -> int:
    return ((x + m - 1) // m) * m


def _t2v_kernel(tau_ref, sel_ref, w_ref, b_ref, m_ref, out_ref):
    """One lane-dense slab.

    tau_ref : (tile_r, group)   f32   `group` logical samples per slab row
    sel_ref : (group, lanew)    f32   0/1 block-diagonal spread matrix
    w_ref   : (1, lanew)        f32   [w | w0] tiled `group` times
    b_ref   : (1, lanew)        f32   [b | b0] tiled `group` times
    m_ref   : (1, lanew)        f32   1.0 on cos (periodic) lanes, 0.0 on linear
    out_ref : (tile_r, lanew)
    """
    # Spread the `group` packed samples across their F-lane slots with a tiny
    # block-diagonal 0/1 matmul. This rides the otherwise-idle MXU slot and,
    # because the nonzeros are exactly 1.0, it is an exact f32 copy of tau.
    spread = jnp.dot(tau_ref[...], sel_ref[...],
                     preferred_element_type=jnp.float32)      # (tile_r, lanew)
    # Fused affine for both branches on the VPU (full f32).
    y = spread * w_ref[...] + b_ref[...]
    # cos on the periodic lanes, identity on the linear lane (mask is a
    # trace-time constant operand: no iota / div / mod per element).
    cos_lane = m_ref[...] != 0.0                               # (1, lanew) bool
    out_ref[...] = jnp.where(cos_lane, jnp.cos(y), y).astype(out_ref.dtype)


def cosine_activation(tau, w, b, w0, b0, *,
                      max_tile_rows: int = 8192,
                      min_rows_for_pallas: int = 2048,
                      out_dtype=jnp.float32):
    """Pallas wrapper mirroring CosineActivation.forward / t2v (in_features == 1)."""
    n, in_features = tau.shape
    # TODO(synk): PyTorch bias broadcasting only matches for in_features == 1
    # (the canonical Time2Vec configuration); other values are not supported.
    assert in_features == 1, "CosineActivation Pallas kernel assumes in_features == 1"

    k = w.shape[1]                       # out_features - 1
    f = k + 1                            # out_features

    # Fuse the two branches once, outside the kernel.
    w_full = jnp.concatenate([w.reshape(1, k), w0.reshape(1, 1)], axis=1).astype(jnp.float32)
    b_full = jnp.concatenate([b.reshape(1, k), b0.reshape(1, 1)], axis=1).astype(jnp.float32)
    tau_f = tau.astype(jnp.float32)

    # --- Small-N fast path: pallas_call dispatch / pipeline fixed cost would
    # dominate tiny batches; a fused XLA elementwise is faster and exact.
    if n < min_rows_for_pallas:
        y = tau_f * w_full + b_full                       # (n, F), in_features == 1
        out = jnp.concatenate([jnp.cos(y[:, :k]), y[:, k:]], axis=1)
        return jnp.squeeze(out.astype(out_dtype))

    # --- Lane-dense packing: group samples per output row; lanew = lcm(F, 128)
    # is always a multiple of 128 -> full-width unmasked stores for any F.
    group = 128 // math.gcd(f, 128)
    lanew = group * f

    # Trace-time constants (no per-tile mask construction in the kernel).
    sel_np = np.kron(np.eye(group, dtype=np.float32),
                     np.ones((1, f), dtype=np.float32))               # (group, lanew)
    mask_np = np.tile(np.concatenate([np.ones((k,), np.float32),
                                      np.zeros((1,), np.float32)]),
                      group).reshape(1, lanew)                        # 1 = cos lane
    sel = jnp.asarray(sel_np)
    cos_mask = jnp.asarray(mask_np)
    w_dense = jnp.tile(w_full, (1, group))                            # (1, lanew)
    b_dense = jnp.tile(b_full, (1, group))                            # (1, lanew)

    # --- Tile sizing against a VMEM budget.
    # Working set per grid step (double buffered):
    #   2 * out tile  (tile_r * lanew * itemsize)
    #   2 * tau tile  (lane-padded to 128 lanes -> tile_r * 128 * 4 bytes)
    # plus the small constant operands. Target ~24 MiB so we stay comfortably
    # under the 32 MiB vmem_limit (safe on v7x's 64 MiB part; conservative but
    # fine on v5e/v6e's 128 MiB).
    itemsize = jnp.dtype(out_dtype).itemsize
    sublane = max(8, 32 // itemsize)                 # 8 for f32, 16 for bf16
    const_bytes = (group + 3) * lanew * 4
    budget = 24 * 1024 * 1024 - 2 * const_bytes
    per_row = 2 * lanew * itemsize + 2 * 128 * 4
    rows_budget = max(sublane, (budget // per_row) // sublane * sublane)
    tile_r = min(_round_up(max_tile_rows, sublane), rows_budget)

    r_total = pl.cdiv(n, group)                      # packed rows needed
    if r_total <= tile_r:
        if r_total >= 1024:
            # Mid-size problem: force >= 2 grid steps so both v7x TensorCores
            # get work (dimension_semantics only shards a multi-step grid).
            tile_r = _round_up(pl.cdiv(r_total, 2), sublane)
        else:
            tile_r = _round_up(max(r_total, 1), sublane)
    r_pad = pl.cdiv(r_total, tile_r) * tile_r
    n_pad = r_pad * group

    tau_flat = tau_f.reshape(n)
    if n_pad != n:
        tau_flat = jnp.pad(tau_flat, (0, n_pad - n))
    tau_grp = tau_flat.reshape(r_pad, group)         # contiguous reshape

    grid = (r_pad // tile_r,)

    out_dense = pl.pallas_call(
        _t2v_kernel,
        out_shape=jax.ShapeDtypeStruct((r_pad, lanew), out_dtype),
        grid=grid,
        in_specs=[
            pl.BlockSpec((tile_r, group), lambda i: (i, 0)),   # tau slabs
            pl.BlockSpec((group, lanew), lambda i: (0, 0)),    # 0/1 spread matrix
            pl.BlockSpec((1, lanew), lambda i: (0, 0)),        # fused weights
            pl.BlockSpec((1, lanew), lambda i: (0, 0)),        # fused biases
            pl.BlockSpec((1, lanew), lambda i: (0, 0)),        # cos-lane mask
        ],
        out_specs=pl.BlockSpec((tile_r, lanew), lambda i: (i, 0)),
        compiler_params=pltpu.CompilerParams(
            dimension_semantics=("parallel",),        # shards grid across TCs on v7x
            vmem_limit_bytes=32 * 1024 * 1024,
        ),
    )(tau_grp, sel, w_dense, b_dense, cos_mask)

    # Unpack the lane-dense slab back to (N, out_features) (contiguous reshape).
    out = out_dense.reshape(n_pad, f)
    if n_pad != n:
        out = out[:n]
    # Matches torch `.squeeze()` (also squeezes batch==1 to a 1-D vector).
    return jnp.squeeze(out)


if __name__ == "__main__":
    # Module config (Time2Vec convention: in_features = 1)
    in_features = 1
    out_features = 32
    batch = 8

    key = jax.random.PRNGKey(0)
    k_tau, k_w0, k_b0, k_w, k_b = jax.random.split(key, 5)

    # Deterministic synthetic parameters (shapes as in __init__; ~ torch.randn)
    w0 = jax.random.normal(k_w0, (in_features, 1), dtype=jnp.float32)
    b0 = jax.random.normal(k_b0, (in_features, 1), dtype=jnp.float32)
    w = jax.random.normal(k_w, (in_features, out_features - 1), dtype=jnp.float32)
    b = jax.random.normal(k_b, (in_features, out_features - 1), dtype=jnp.float32)
    tau = jax.random.normal(k_tau, (batch, in_features), dtype=jnp.float32)

    # Pure-JAX reference of the module's math (in_features == 1, so matmul is a
    # broadcasted multiply; this sidesteps XLA's default-precision dot).
    def ref_fn(t):
        v1 = jnp.cos(t * w.reshape(1, -1) + b.reshape(1, -1))
        v2 = t * w0.reshape(1, 1) + b0.reshape(1, 1)
        return jnp.squeeze(jnp.concatenate([v1, v2], axis=1))

    # Force the Pallas path even at this tiny demo size.
    out = cosine_activation(tau, w, b, w0, b0, min_rows_for_pallas=1)
    out = jax.block_until_ready(out)
    ref = ref_fn(tau)
    assert out.shape == (batch, out_features), out.shape
    assert jnp.allclose(out, ref, atol=1e-4, rtol=1e-4), float(jnp.max(jnp.abs(out - ref)))

    # Also exercise the multi-tile (grid > 1) + batch-padding path once.
    batch2 = 4100
    tau2 = jax.random.normal(k_tau, (batch2, in_features), dtype=jnp.float32)
    out2 = jax.block_until_ready(
        cosine_activation(tau2, w, b, w0, b0, min_rows_for_pallas=1))
    ref2 = ref_fn(tau2)
    assert out2.shape == (batch2, out_features), out2.shape
    assert jnp.allclose(out2, ref2, atol=1e-4, rtol=1e-4), float(jnp.max(jnp.abs(out2 - ref2)))

    print("KERNEL_OK")
</pallas_src>

<mosaic_0001>
module attributes {stable_mosaic.version = 11 : i64} {
  func.func @_t2v_kernel(%arg0: i32, %arg1: memref<8x4xf32, #tpu.memory_space<vmem>>, %arg2: memref<4x128xf32, #tpu.memory_space<vmem>>, %arg3: memref<1x128xf32, #tpu.memory_space<vmem>>, %arg4: memref<1x128xf32, #tpu.memory_space<vmem>>, %arg5: memref<1x128xf32, #tpu.memory_space<vmem>>, %arg6: memref<8x128xf32, #tpu.memory_space<vmem>>) attributes {dimension_semantics = [#tpu.dimension_semantics<parallel>], iteration_bounds = array<i64: 1>, scalar_prefetch = 0 : i64, scratch_operands = 0 : i64, tpu.core_type = #tpu.core_type<tc>, window_params = [{transform_indices = @transform_0, window_bounds = array<i64: 8, 4>}, {pipeline_mode = #tpu.pipeline_mode<synchronous>, transform_indices = @transform_1, window_bounds = array<i64: 4, 128>}, {pipeline_mode = #tpu.pipeline_mode<synchronous>, transform_indices = @transform_2, window_bounds = array<i64: 1, 128>}, {pipeline_mode = #tpu.pipeline_mode<synchronous>, transform_indices = @transform_3, window_bounds = array<i64: 1, 128>}, {pipeline_mode = #tpu.pipeline_mode<synchronous>, transform_indices = @transform_4, window_bounds = array<i64: 1, 128>}, {transform_indices = @transform_5, window_bounds = array<i64: 8, 128>}]} {
    %c0 = arith.constant 0 : index
    %c0_0 = arith.constant 0 : index
    %0 = vector.load %arg1[%c0, %c0_0] : memref<8x4xf32, #tpu.memory_space<vmem>>, vector<8x4xf32>
    %c0_1 = arith.constant 0 : index
    %c0_2 = arith.constant 0 : index
    %1 = vector.load %arg2[%c0_1, %c0_2] : memref<4x128xf32, #tpu.memory_space<vmem>>, vector<4x128xf32>
    %cst = arith.constant dense<0.000000e+00> : vector<8x128xf32>
    %2 = tpu.matmul %0, %1, %cst {dimension_numbers = #tpu.dot_dimension_numbers<[1], [0], [0], [1], [0, 0, 1, 1], [], []>} : vector<8x4xf32>, vector<4x128xf32>, vector<8x128xf32> -> vector<8x128xf32>
    %c0_3 = arith.constant 0 : index
    %c0_4 = arith.constant 0 : index
    %3 = vector.load %arg3[%c0_3, %c0_4] : memref<1x128xf32, #tpu.memory_space<vmem>>, vector<1x128xf32>
    %4 = vector.broadcast %3 : vector<1x128xf32> to vector<8x128xf32>
    %5 = arith.mulf %2, %4 : vector<8x128xf32>
    %c0_5 = arith.constant 0 : index
    %c0_6 = arith.constant 0 : index
    %6 = vector.load %arg4[%c0_5, %c0_6] : memref<1x128xf32, #tpu.memory_space<vmem>>, vector<1x128xf32>
    %7 = vector.broadcast %6 : vector<1x128xf32> to vector<8x128xf32>
    %8 = arith.addf %5, %7 : vector<8x128xf32>
    %c0_7 = arith.constant 0 : index
    %c0_8 = arith.constant 0 : index
    %9 = vector.load %arg5[%c0_7, %c0_8] : memref<1x128xf32, #tpu.memory_space<vmem>>, vector<1x128xf32>
    %cst_9 = arith.constant 0.000000e+00 : f32
    %10 = vector.broadcast %cst_9 : f32 to vector<1x128xf32>
    %11 = arith.cmpf one, %9, %10 : vector<1x128xf32>
    %12 = math.cos %8 : vector<8x128xf32>
    %13 = vector.shape_cast %11 : vector<1x128xi1> to vector<1x128xi1>
    %14 = vector.broadcast %13 : vector<1x128xi1> to vector<8x128xi1>
    %15 = arith.select %14, %12, %8 : vector<8x128xi1>, vector<8x128xf32>
    %c0_10 = arith.constant 0 : index
    %c0_11 = arith.constant 0 : index
    %16 = vector.load %arg6[%c0_10, %c0_11] : memref<8x128xf32, #tpu.memory_space<vmem>>, vector<8x128xf32>
    tpu.vector_store %arg6[%c0_10, %c0_11], %15 {strides = array<i32>} : memref<8x128xf32, #tpu.memory_space<vmem>>, vector<8x128xf32>,
    return
  }
  func.func @transform_0(%arg0: i32) -> (i32, i32) {
    %c0_i32 = arith.constant 0 : i32
    %c0_i32_0 = arith.constant 0 : i32
    return %arg0, %c0_i32 : i32, i32
  }
  func.func @transform_1(%arg0: i32) -> (i32, i32) {
    %c0_i32 = arith.constant 0 : i32
    %c0_i32_0 = arith.constant 0 : i32
    %c0_i32_1 = arith.constant 0 : i32
    return %c0_i32, %c0_i32_0 : i32, i32
  }
  func.func @transform_2(%arg0: i32) -> (i32, i32) {
    %c0_i32 = arith.constant 0 : i32
    %c0_i32_0 = arith.constant 0 : i32
    %c0_i32_1 = arith.constant 0 : i32
    return %c0_i32, %c0_i32_0 : i32, i32
  }
  func.func @transform_3(%arg0: i32) -> (i32, i32) {
    %c0_i32 = arith.constant 0 : i32
    %c0_i32_0 = arith.constant 0 : i32
    %c0_i32_1 = arith.constant 0 : i32
    return %c0_i32, %c0_i32_0 : i32, i32
  }
  func.func @transform_4(%arg0: i32) -> (i32, i32) {
    %c0_i32 = arith.constant 0 : i32
    %c0_i32_0 = arith.constant 0 : i32
    %c0_i32_1 = arith.constant 0 : i32
    return %c0_i32, %c0_i32_0 : i32, i32
  }
  func.func @transform_5(%arg0: i32) -> (i32, i32) {
    %c0_i32 = arith.constant 0 : i32
    %c0_i32_0 = arith.constant 0 : i32
    return %arg0, %c0_i32 : i32, i32
  }
}

</mosaic_0001>

<bundles_post_ra>
// kernel: tpu_custom_call.1
= control target key start
LH: loop header
LB: loop body
LE: loop exit
PB: predicated region body
PF: predicated region fallthrough
CT: control target
= control target key end

     0   :  { %vm27_vm0 = vcmask 1043456   ;;  %v299_v2 = vmov 0.0   ;;  %vm300_vm1 = vmmov 0   ;;  %vm23_vm2 = vcmask 31744   ;;  %s379_s0 = inlined_call_operand.vmem [shape: f32[8,4], index: 0, kind: input, shape index: {}]   ;;  %s380_s1 = inlined_call_operand.vmem [shape: f32[4,128], index: 1, kind: input, shape index: {}]   ;;  %s381_s2 = inlined_call_operand.vmem [shape: f32[1,128], index: 2, kind: input, shape index: {}]   ;;  %s382_s3 = inlined_call_operand.vmem [shape: f32[1,128], index: 3, kind: input, shape index: {}]   ;;  %s383_s4 = inlined_call_operand.vmem [shape: f32[1,128], index: 4, kind: input, shape index: {}]   ;;  %s384_s5 = inlined_call_operand.hbm [shape: f32[8,128], index: 5, kind: output, shape index: {}]  }
   0x1   :  { %v22_v0 = vld [vmem:[%s380_s1] sm:$0xf]  ;;  %254 = vmatprep.subr.mxu0 %v299_v2  ;;  %256 = vmatprep.mubr.msk.f32.mxu0 %vm300_vm1, %v299_v2 }
   0x2   :  { %v21_v1 = vld [vmem:[%s379_s0] sm:$0xff] }
   0x3   :  { %10 = vsyncpa [#allocation3], 0  ;;  %255 = vmatpush3.msk.msra.mxu0 %vm27_vm0, %v22_v0  ;;  %v246_v3 = vld [vmem:[%s381_s2] ss:$0 sm:$0xff]  ;;  %v301_v19 = vmov 683565275  }
   0x4   :  { %257 = vmatmul.mubr.msk.f32.vlgmr.msra.gmra.mxu0 %vm23_vm2, %v21_v1  ;;  %v247_v5 = vld [vmem:[%s382_s3] ss:$0 sm:$0xff]  ;;  %v302_v21 = vmov 2475754826   ;;  %v303_v24 = vmov 2131351028  }
   0x5   :  { %v304_v27 = vmov 2102212464   ;;  %v305_v30 = vmov 920167782   ;;  %v306_v33 = vmov 1326507024  }
   0x6   :  { %s308_s3 = smov [#allocation2]  }
   0x7   :  { %s236_s25 = sshll.u32 %s308_s3, 4  ;;  %s237_s25 = int_to_ptr.vmem [resolvable:$true] %s236_s25 }
   0x8   :  { %p282_p1 = scmp.lt.s32.totalorder %s237_s25, %s237_s25 }
  0xc4   :  { %v97_v4 = vpop.f32.mrf.mxu0 }
  0xc5   :  { %v108_v6 = vmul.f32 %v246_v3, %v97_v4 }
  0xc6   :  { %v258_v7 = vpop.f32.mrf.mxu0 }
  0xc7   :  { %v351_v8 = vadd.f32 %v247_v5, %v108_v6 }
  0xc9   :  { %v122_v9 = vand.u32 2139095040, %v351_v8  ;;  %v119_v13 = vand.u32 2147483647, %v351_v8  ;;  %vm121_vm10 = vcmp.lt.s32.totalorder %v351_v8, 0  ;;  %vm211_vm1 = vweird.f32 %v351_v8 }
  0xcb   :  { %v123_v10 = vshrl.u32 %v122_v9, 23  ;;  %v126_v17 = vand.u32 8388607, %v119_v13  ;;  %vm120_vm11 = vcmp.le.f32.partialorder %v119_v13, 0.7853982 }
  0xcd   :  { %v248_v11 = vadd.s32 4294967169, %v123_v10  ;;  %v127_v35 = vor.u32 8388608, %v126_v17 }
  0xcf   :  { %v129_v12 = vadd.s32 1, %v248_v11  ;;  %v167_v49 = vshll.u32 %v127_v35, 8 }
  0xd1   :  { %vm130_vm3 = vcmp.gt.s32.totalorder %v129_v12, 0 }
  0xd2   :  { %v131_v14 = vsel %vm130_vm3, %v129_v12, 0 }
  0xd3   :  { %v133_v15 = vand.u32 31, %v131_v14  ;;  %v132_v18 = vshrl.u32 %v131_v14, 5 }
  0xd5   :  { %v134_v16 = vsub.s32 32, %v133_v15  ;;  %v136_v20 = vshll.u32 %v301_v19, %v133_v15  ;;  %v139_v22 = vshll.u32 %v302_v21, %v133_v15  ;;  %v142_v26 = vshll.u32 %v303_v24, %v133_v15 }
  0xd6   :  { %v145_v29 = vshll.u32 %v304_v27, %v133_v15  ;;  %v148_v32 = vshll.u32 %v305_v30, %v133_v15  ;;  %vm151_vm4 = vcmp.lt.s32.totalorder %v132_v18, 1  ;;  %vm154_vm5 = vcmp.lt.s32.totalorder %v132_v18, 4 }
  0xd7   :  { %v137_v23 = vshrl.u32 %v302_v21, %v134_v16  ;;  %v140_v25 = vshrl.u32 %v303_v24, %v134_v16  ;;  %v143_v28 = vshrl.u32 %v304_v27, %v134_v16  ;;  %v146_v31 = vshrl.u32 %v305_v30, %v134_v16  ;;  %v117_v27 = vld [vmem:[%s383_s4] sm:$0x1]  ;;  %s277_s4 = scalar_lea.vmem %s237_s25, 128 }
  0xd8   :  { %v149_v34 = vshrl.u32 %v306_v33, %v134_v16  ;;  %v135_v44 = vshrl.u32 %v301_v19, %v134_v16  ;;  %vm153_vm6 = vcmp.lt.s32.totalorder %v132_v18, 3  ;;  %vm152_vm7 = vcmp.lt.s32.totalorder %v132_v18, 2  ;;  %p278_p0 = scmp.ne.s32.totalorder %s237_s25, %s277_s4  ;;  %p283_p2 = scmp.lt.s32.totalorder %s277_s4, %s277_s4 }
  0xd9   :  { %v138_v36 = vor.u32 %v137_v23, %v136_v20  ;;  %v141_v37 = vor.u32 %v140_v25, %v139_v22  ;;  %v144_v38 = vor.u32 %v143_v28, %v142_v26  ;;  %v147_v39 = vor.u32 %v146_v31, %v145_v29 }
  0xda   :  { %v150_v40 = vor.u32 %v149_v34, %v148_v32  ;;  %v223_v26 = vlaneseq  ;;  %vm118_vm12 = vcmp.ne.f32.partialorder %v117_v27, 0.0  ;;  %v307_v32 = vmov 0   ;;  %p284_p3 = por %p283_p2, %p282_p1 }
  0xdb   :  { %v156_v41 = vsel %vm154_vm5, %v144_v38, 2102212464  ;;  %v159_v42 = vsel %vm151_vm4, %v138_v36, %v141_v37  ;;  %v163_v43 = vsel %vm151_vm4, %v141_v37, %v144_v38  ;;  %v160_v45 = vsel %vm154_vm5, %v147_v39, 920167782 }
  0xdc   :  { %v164_v46 = vsel %vm154_vm5, %v150_v40, 1326507024  ;;  %v161_v47 = vsel %vm153_vm6, %v144_v38, %v160_v45  ;;  %v155_v50 = vsel %vm151_vm4, %v135_v44, %v138_v36  ;;  %v157_v51 = vsel %vm153_vm6, %v141_v37, %v156_v41  ;;  %p285_p4 = pnand %p284_p3, %p278_p0 }
  0xdd   :  { %v165_v48 = vsel %vm153_vm6, %v147_v39, %v164_v46  ;;  %v162_v52 = vsel %vm152_vm7, %v159_v42, %v161_v47  ;;  %v158_v58 = vsel %vm152_vm7, %v155_v50, %v157_v51  ;;  %v224_v29 = vshrl.u32 %v223_v26, 7 }
  0xde   :  { %v166_v53 = vsel %vm152_vm7, %v163_v43, %v165_v48  ;;  %v360_v56 = vmul.u32.u64.low %v167_v49, %v162_v52  ;;  %v361_v57 = vmul.u32.u64.high %v167_v49, %v162_v52, %v360_v56  ;;  %v174_v60 = vmul.u32 %v167_v49, %v158_v58 }
  0xdf   :  { %v357_v54 = vmul.u32.u64.low %v167_v49, %v166_v53  ;;  %v358_v55 = vmul.u32.u64.high %v167_v49, %v166_v53, %v357_v54  ;;  %v225_v31 = vsub.s32 0, %v224_v29  ;;  %v222_v33 = vsel %vm118_vm12, 1, %v307_v32 }
  0xe0   :  { %v177_v59 = vadd.s32 1, %v361_v57 }
  0xe1   :  { %vm176_vm8 = vc.u32 %v358_v55, %v360_v56  ;;  %v175_v9 = vadd.s32 %v360_v56, %v358_v55  ;;  %v226_v35 = vrot.slane %v222_v33, %v225_v31 }
  0xe2   :  { %v178_v61 = vsel %vm176_vm8, %v177_v59, %v361_v57 }
  0xe3   :  { %v179_v62 = vadd.s32 %v178_v61, %v174_v60  ;;  %vm227_vm0 = vcmp.eq.s32.totalorder %v226_v35, 1 }
  0xe5   :  { %v180_v63 = vadd.s32 536870912, %v179_v62 }
  0xe7   :  { %v181_v0 = vshrl.u32 %v180_v63, 30 }
  0xe9   :  { %v182_v1 = vshll.u32 %v181_v0, 30  ;;  %v205_v25 = vsub.s32 4, %v181_v0 }
  0xeb   :  { %v183_v2 = vsub.s32 %v179_v62, %v182_v1  ;;  %v206_v28 = vsel %vm121_vm10, %v205_v25, %v181_v0 }
  0xec   :  { %v208_v30 = vsel %vm120_vm11, 0, %v206_v28 }
  0xed   :  { %v185_v3 = vsub.s32 0, %v183_v2  ;;  %v212_v34 = vand.u32 3, %v208_v30 }
  0xef   :  { %v249_v4 = vmin.u32 %v185_v3, %v183_v2  ;;  %vm217_vm13 = vcmp.eq.s32.totalorder %v212_v34, 2  ;;  %vm214_vm14 = vcmp.eq.s32.totalorder %v212_v34, 0  ;;  %vm213_vm15 = vcmp.lt.s32.totalorder %v212_v34, 2 }
  0xf1   :  { %v187_v5 = vclz %v249_v4 }
  0xf3   :  { %v250_v6 = vadd.s32 4294967294, %v187_v5 }
  0xf5   :  { %vm251_vm9 = vcmp.lt.s32.totalorder %v250_v6, 0 }
  0xf6   :  { %v190_v7 = vsel %vm251_vm9, 0, %v250_v6 }
  0xf7   :  { %v191_v10 = vsub.s32 32, %v190_v7  ;;  %v195_v11 = vsub.s32 4294967266, %v190_v7  ;;  %v192_v12 = vshll.u32 %v183_v2, %v190_v7 }
  0xf9   :  { %v193_v14 = vshrl.u32 %v175_v9, %v191_v10  ;;  %v196_v15 = vadd.s32 127, %v195_v11 }
  0xfb   :  { %v194_v16 = vor.u32 %v193_v14, %v192_v12  ;;  %v197_v17 = vshll.u32 %v196_v15, 23 }
  0xfd   :  { %v198_v18 = vor.u32 4788187, %v197_v17  ;;  %v201_v20 = vcvt.s32.f32 %v194_v16 }
  0xff   :  { %v199_v19 = vand.u32 2147483647, %v198_v18 }
 0x101   :  { %v202_v21 = vmul.f32 %v201_v20, %v199_v19 }
 0x103   :  { %v203_v22 = vxor.u32 2147483648, %v202_v21 }
 0x105   :  { %v204_v23 = vsel %vm121_vm10, %v203_v22, %v202_v21 }
 0x106   :  { %v207_v24 = vsel %vm120_vm11, %v351_v8, %v204_v23 }
 0x107   :  { %273 = vcosq.f32 %v207_v24 }
 0x108   :  { %275 = vsinq.f32 %v207_v24 }
 0x114   :  { %v274_v13 = vpop.eup %273 }
 0x115   :  { %v276_v36 = vpop.eup %275  ;;  %v218_v37 = vxor.u32 2147483648, %v274_v13 }
 0x116   :  { %v215_v38 = vxor.u32 2147483648, %v276_v36 }
 0x117   :  { %v219_v39 = vsel %vm217_vm13, %v218_v37, %v276_v36 }
 0x118   :  { %v216_v40 = vsel %vm214_vm14, %v274_v13, %v215_v38 }
 0x119   :  { %v220_v41 = vsel %vm213_vm15, %v216_v40, %v219_v39 }
 0x11a   :  { %v221_v42 = vsel %vm211_vm1, nan, %v220_v41 }
 0x11b   :  { %v228_v43 = vsel %vm227_vm0, %v221_v42, %v351_v8 }
 0x11c   :  { %229 = vst [vmem:[#allocation2] sm:$0xff] %v228_v43 }
 0x11d   :  { %288 = shalt.err (!%p285_p4)
}
 0x11e   :  { %239 = dma.vmem_to_hbm [thread:$0]  %s237_s25, 128, %s384_s5, [#allocation3]  }
 0x11f   :  { %297 = dma.done.wait [#allocation3], 128  }
 0x120   :  { %298 = vsyncadd [#allocation3], 4294967168 }
 0x121   :  { %243 = vsyncpa [#allocation3], 1 }

</bundles_post_ra>
